<compile_context>
chip_gen: v7x
topology: tpu7x:2x2x1
jax: 0.10.0
libtpu: 0.0.40
codegen_flags: <defaults>
</compile_context>

<pallas_src>
import functools

import jax
import jax.numpy as jnp
from jax.experimental import pallas as pl
from jax.experimental.pallas import tpu as pltpu


def _round_up(x: int, m: int) -> int:
    return ((x + m - 1) // m) * m


def _masked_linear_kernel_single_k(x_ref, w_ref, b_ref, o_ref):
    # Mask already folded into w_ref/b_ref by the wrapper; K fits in one tile,
    # so no accumulator scratch is needed: matmul -> bias add -> store.
    y = jnp.dot(x_ref[...], w_ref[...], preferred_element_type=jnp.float32)
    o_ref[...] = (y + b_ref[...]).astype(o_ref.dtype)


def _masked_linear_kernel_multi_k(x_ref, w_ref, b_ref, o_ref, acc_ref):
    # K is split across grid axis 2; accumulate in f32 VMEM scratch.
    k = pl.program_id(2)

    @pl.when(k == 0)
    def _():
        acc_ref[...] = jnp.zeros_like(acc_ref)

    acc_ref[...] += jnp.dot(
        x_ref[...], w_ref[...], preferred_element_type=jnp.float32
    )

    @pl.when(k == pl.num_programs(2) - 1)
    def _():
        o_ref[...] = (acc_ref[...] + b_ref[...]).astype(o_ref.dtype)


@functools.partial(
    jax.jit, static_argnames=("block_m", "block_n", "block_k", "compute_dtype")
)
def masked_linear(x, w, b, mask, *, block_m=256, block_n=512, block_k=512,
                  compute_dtype=None):
    """MaskedLayer forward with base = Linear: (x @ w + b) * mask.

    x:    (M, K) activations
    w:    (K, N) Linear weight, stored pre-transposed (in_features, out_features)
    b:    (N,)   Linear bias
    mask: (N,)   learnable MaskedLayer mask
    """
    M, K = x.shape
    K2, N = w.shape
    assert K == K2 and b.shape == (N,) and mask.shape == (N,)
    out_dtype = x.dtype

    # --- Fold the mask into the Linear parameters (wrapper-side, amortized
    #     over all M rows):  (x @ w + b) * m == x @ (w * m) + (b * m).
    w_m = w * mask[None, :]
    b_m = b * mask

    # Optional native-MXU operand dtype (accumulation stays f32 in-kernel).
    if compute_dtype is not None:
        x = x.astype(compute_dtype)
        w_m = w_m.astype(compute_dtype)
        b_m = b_m.astype(compute_dtype)

    # --- Tile sizes: lane-dense (multiples of 128 on the last dims, multiple
    #     of 8 sublanes on M), clipped so tiny problems don't over-pad.
    tm = min(block_m, _round_up(M, 8))
    tn = min(block_n, _round_up(N, 128))
    tk = min(block_k, _round_up(K, 128))

    M_pad = _round_up(M, tm)
    N_pad = _round_up(N, tn)
    K_pad = _round_up(K, tk)

    x_p = jnp.pad(x, ((0, M_pad - M), (0, K_pad - K)))
    w_p = jnp.pad(w_m, ((0, K_pad - K), (0, N_pad - N)))
    b_p = jnp.pad(b_m, (0, N_pad - N)).reshape(1, N_pad)

    gm, gn, gk = M_pad // tm, N_pad // tn, K_pad // tk
    grid = (gm, gn, gk)

    itemsize = lambda a: a.size * a.dtype.itemsize
    cost = pl.CostEstimate(
        flops=2 * M_pad * K_pad * N_pad,
        transcendentals=0,
        bytes_accessed=itemsize(x_p) + itemsize(w_p) + itemsize(b_p)
        + M_pad * N_pad * jnp.dtype(out_dtype).itemsize,
    )

    in_specs = [
        # Activation tiles stream along (M, K).
        pl.BlockSpec((tm, tk), lambda i, j, k: (i, k)),
        # Folded weight tiles: resident across the M axis.
        pl.BlockSpec((tk, tn), lambda i, j, k: (k, j)),
        # Folded bias tile: resident across M and K.
        pl.BlockSpec((1, tn), lambda i, j, k: (0, j)),
    ]
    out_spec = pl.BlockSpec((tm, tn), lambda i, j, k: (i, j))

    if gk == 1:
        kernel = _masked_linear_kernel_single_k
        scratch_shapes = ()
    else:
        kernel = _masked_linear_kernel_multi_k
        scratch_shapes = [pltpu.VMEM((tm, tn), jnp.float32)]

    out = pl.pallas_call(
        kernel,
        out_shape=jax.ShapeDtypeStruct((M_pad, N_pad), out_dtype),
        grid_spec=pltpu.PrefetchScalarGridSpec(
            num_scalar_prefetch=0,
            grid=grid,
            in_specs=in_specs,
            out_specs=out_spec,
            scratch_shapes=scratch_shapes,
        ),
        compiler_params=pltpu.CompilerParams(
            # M/N axes are embarrassingly parallel -> shard across the two
            # v7x TensorCores; K is a reduction -> arbitrary.
            dimension_semantics=("parallel", "parallel", "arbitrary"),
        ),
        cost_estimate=cost,
    )(x_p, w_p, b_p)

    # Strip the zero padding back off.
    return out[:M, :N]


if __name__ == "__main__":
    key = jax.random.PRNGKey(0)
    k_x, k_w, k_b, k_m = jax.random.split(key, 4)

    # Small shapes consistent with the module (batch=8, hidden=32).
    batch, in_features, out_features = 8, 32, 32

    x = jax.random.normal(k_x, (batch, in_features), dtype=jnp.float32)
    # Parameters of base = nn.Linear(in_features, out_features); weight stored
    # as (in_features, out_features), i.e. already transposed for y = x @ W.
    w = jax.random.normal(k_w, (in_features, out_features), dtype=jnp.float32) * 0.1
    b = jax.random.normal(k_b, (out_features,), dtype=jnp.float32) * 0.1
    # Learnable mask parameter of MaskedLayer (per output feature).
    mask = jax.random.uniform(k_m, (out_features,), dtype=jnp.float32)

    # Pure-JAX reference of the exact module semantics: base(x) * mask.
    ref = (x @ w + b) * mask

    # f32 path (exact up to fp reassociation from the mask fold).
    out = jax.block_until_ready(masked_linear(x, w, b, mask))
    assert out.shape == ref.shape
    assert jnp.allclose(out, ref, atol=1e-5, rtol=1e-5), "f32 mismatch vs reference"

    # bf16-operand path (native MXU input dtype, f32 accumulation).
    out_bf16 = jax.block_until_ready(
        masked_linear(x, w, b, mask, compute_dtype=jnp.bfloat16)
    )
    assert jnp.allclose(out_bf16, ref, atol=5e-2, rtol=5e-2), "bf16 mismatch vs reference"

    # Larger shape exercising the multi-K-tile accumulator path.
    Mb, Kb, Nb = 512, 1024, 640
    xb = jax.random.normal(k_x, (Mb, Kb), dtype=jnp.float32)
    wb = jax.random.normal(k_w, (Kb, Nb), dtype=jnp.float32) * 0.02
    bb = jax.random.normal(k_b, (Nb,), dtype=jnp.float32) * 0.1
    mb = jax.random.uniform(k_m, (Nb,), dtype=jnp.float32)
    refb = (xb @ wb + bb) * mb
    outb = jax.block_until_ready(masked_linear(xb, wb, bb, mb, block_k=512))
    assert jnp.allclose(outb, refb, atol=1e-3, rtol=1e-3), "multi-K mismatch vs reference"

    print("KERNEL_OK")
</pallas_src>

<mosaic_0001>
module attributes {stable_mosaic.version = 11 : i64} {
  func.func @_masked_linear_kernel_single_k(%arg0: i32, %arg1: i32, %arg2: i32, %arg3: memref<8x128xf32, #tpu.memory_space<vmem>>, %arg4: memref<128x128xf32, #tpu.memory_space<vmem>>, %arg5: memref<1x128xf32, #tpu.memory_space<vmem>>, %arg6: memref<8x128xf32, #tpu.memory_space<vmem>>) attributes {dimension_semantics = [#tpu.dimension_semantics<parallel>, #tpu.dimension_semantics<parallel>, #tpu.dimension_semantics<arbitrary>], iteration_bounds = array<i64: 1, 1, 1>, scalar_prefetch = 0 : i64, scratch_operands = 0 : i64, tpu.core_type = #tpu.core_type<tc>, window_params = [{transform_indices = @transform_0, window_bounds = array<i64: 8, 128>}, {transform_indices = @transform_1, window_bounds = array<i64: 128, 128>}, {transform_indices = @transform_2, window_bounds = array<i64: 1, 128>}, {transform_indices = @transform_3, window_bounds = array<i64: 8, 128>}]} {
    %c0 = arith.constant 0 : index
    %c0_0 = arith.constant 0 : index
    %0 = vector.load %arg3[%c0, %c0_0] : memref<8x128xf32, #tpu.memory_space<vmem>>, vector<8x128xf32>
    %c0_1 = arith.constant 0 : index
    %c0_2 = arith.constant 0 : index
    %1 = vector.load %arg4[%c0_1, %c0_2] : memref<128x128xf32, #tpu.memory_space<vmem>>, vector<128x128xf32>
    %cst = arith.constant dense<0.000000e+00> : vector<8x128xf32>
    %2 = tpu.matmul %0, %1, %cst {dimension_numbers = #tpu.dot_dimension_numbers<[1], [0], [0], [1], [0, 0, 1, 1], [], []>} : vector<8x128xf32>, vector<128x128xf32>, vector<8x128xf32> -> vector<8x128xf32>
    %c0_3 = arith.constant 0 : index
    %c0_4 = arith.constant 0 : index
    %3 = vector.load %arg5[%c0_3, %c0_4] : memref<1x128xf32, #tpu.memory_space<vmem>>, vector<1x128xf32>
    %4 = vector.broadcast %3 : vector<1x128xf32> to vector<8x128xf32>
    %5 = arith.addf %2, %4 : vector<8x128xf32>
    %c0_5 = arith.constant 0 : index
    %c0_6 = arith.constant 0 : index
    %6 = vector.load %arg6[%c0_5, %c0_6] : memref<8x128xf32, #tpu.memory_space<vmem>>, vector<8x128xf32>
    tpu.vector_store %arg6[%c0_5, %c0_6], %5 {strides = array<i32>} : memref<8x128xf32, #tpu.memory_space<vmem>>, vector<8x128xf32>,
    return
  }
  func.func @transform_0(%arg0: i32, %arg1: i32, %arg2: i32) -> (i32, i32) {
    %c0_i32 = arith.constant 0 : i32
    return %arg0, %arg2 : i32, i32
  }
  func.func @transform_1(%arg0: i32, %arg1: i32, %arg2: i32) -> (i32, i32) {
    %c0_i32 = arith.constant 0 : i32
    return %arg2, %arg1 : i32, i32
  }
  func.func @transform_2(%arg0: i32, %arg1: i32, %arg2: i32) -> (i32, i32) {
    %c0_i32 = arith.constant 0 : i32
    %c0_i32_0 = arith.constant 0 : i32
    return %c0_i32, %arg1 : i32, i32
  }
  func.func @transform_3(%arg0: i32, %arg1: i32, %arg2: i32) -> (i32, i32) {
    %c0_i32 = arith.constant 0 : i32
    return %arg0, %arg1 : i32, i32
  }
}

</mosaic_0001>

<bundles_post_ra>
// kernel: mul.9
= control target key start
LH: loop header
LB: loop body
LE: loop exit
PB: predicated region body
PF: predicated region fallthrough
CT: control target
= control target key end

     0   :  { %s34_s0 = inlined_call_operand.vmem [shape: f32[32], index: 0, kind: input, shape index: {}]   ;;  %s35_s1 = inlined_call_operand.vmem [shape: f32[32], index: 1, kind: input, shape index: {}]   ;;  %s36_s2 = inlined_call_operand.vmem [shape: f32[32], index: 2, kind: output, shape index: {}]  }
   0x1   :  { %v3_v0 = vld [vmem:[%s34_s0] sm:$0x1] }
   0x2   :  { %v4_v1 = vld [vmem:[%s35_s1] sm:$0x1] }
   0x3   :  { %v7_v2 = vmul.f32 %v4_v1, %v3_v0 }
   0x5   :  { %9 = vst [vmem:[%s36_s2] sm:$0x1] %v7_v2 }

// kernel: masked_linear.1
= control target key start
LH: loop header
LB: loop body
LE: loop exit
PB: predicated region body
PF: predicated region fallthrough
CT: control target
= control target key end

     0   :  { %v229_v3 = vmov 0.0|0.0   ;;  %vm230_vm0 = vmmov 0   ;;  %v231_v6 = vmov 0.0   ;;  %s319_s0 = inlined_call_operand.vmem [shape: f32[8,128], index: 0, kind: input, shape index: {}]   ;;  %s320_s1 = inlined_call_operand.vmem [shape: f32[128,128], index: 1, kind: input, shape index: {}]   ;;  %s321_s2 = inlined_call_operand.vmem [shape: f32[1,128], index: 2, kind: input, shape index: {}]   ;;  %s322_s3 = inlined_call_operand.hbm [shape: f32[8,128], index: 3, kind: output, shape index: {}]  }
   0x1   :  { %v16_v0 = vld [vmem:[%s320_s1] sm:$0xff]  ;;  %v17_v1 = vld [vmem:[%s320_s1 + $0x8] sm:$0xff]  ;;  %v18_v2 = vld [vmem:[%s320_s1 + $0x10] sm:$0xff]  ;;  %177 = vmatprep.subr.bf16.mxu0 %v229_v3  ;;  %174 = vmatprep.mubr.msk.f32.mxu0 %vm230_vm0, %v231_v6 }
   0x2   :  { %v178_v4 = vpack.c.bf16 %v17_v1, %v16_v0  ;;  %v19_v5 = vld [vmem:[%s320_s1 + $0x18] sm:$0xff]  ;;  %v20_v8 = vld [vmem:[%s320_s1 + $0x20] sm:$0xff]  ;;  %v21_v9 = vld [vmem:[%s320_s1 + $0x28] sm:$0xff] }
   0x3   :  { %v181_v7 = vpack.c.bf16 %v19_v5, %v18_v2 }
   0x4   :  { %179 = vmatpush3.bf16.msra.mxu0 %v178_v4 }
   0x5   :  { %180 = vmatprep.subr.bf16.mxu0 %v229_v3 }
   0x6   :  { %8 = vsyncpa [#allocation3], 0  ;;  %v184_v10 = vpack.c.bf16 %v21_v9, %v20_v8  ;;  %v22_v11 = vld [vmem:[%s320_s1 + $0x30] sm:$0xff]  ;;  %v23_v12 = vld [vmem:[%s320_s1 + $0x38] sm:$0xff]  ;;  %s232_s21 = smov [#allocation2]  }
   0x7   :  { %v187_v13 = vpack.c.bf16 %v23_v12, %v22_v11  ;;  %v24_v14 = vld [vmem:[%s320_s1 + $0x40] sm:$0xff]  ;;  %v25_v15 = vld [vmem:[%s320_s1 + $0x48] sm:$0xff]  ;;  %v26_v17 = vld [vmem:[%s320_s1 + $0x50] sm:$0xff]  ;;  %s116_s22 = sshll.u32 %s232_s21, 4  ;;  %s117_s22 = int_to_ptr.vmem [resolvable:$true] %s116_s22 }
   0x8   :  { %182 = vmatpush3.bf16.msra.mxu0 %v181_v7  ;;  %v190_v16 = vpack.c.bf16 %v25_v15, %v24_v14  ;;  %v27_v18 = vld [vmem:[%s320_s1 + $0x58] sm:$0xff]  ;;  %v28_v20 = vld [vmem:[%s320_s1 + $0x60] sm:$0xff]  ;;  %v29_v21 = vld [vmem:[%s320_s1 + $0x68] sm:$0xff]  ;;  %p210_p1 = scmp.lt.s32.totalorder %s117_s22, %s117_s22 }
   0x9   :  { %183 = vmatprep.subr.bf16.mxu0 %v229_v3  ;;  %v193_v19 = vpack.c.bf16 %v27_v18, %v26_v17  ;;  %v196_v22 = vpack.c.bf16 %v29_v21, %v28_v20  ;;  %v30_v23 = vld [vmem:[%s320_s1 + $0x70] sm:$0xff]  ;;  %v31_v24 = vld [vmem:[%s320_s1 + $0x78] sm:$0xff]  ;;  %v15_v26 = vld [vmem:[%s319_s0] sm:$0xff]  ;;  %s205_s1 = scalar_lea.vmem %s117_s22, 128 }
   0xa   :  { %v199_v25 = vpack.c.bf16 %v31_v24, %v30_v23  ;;  %v124_v27 = vld [vmem:[%s321_s2] ss:$0 sm:$0xff]  ;;  %p206_p0 = scmp.ne.s32.totalorder %s117_s22, %s205_s1  ;;  %p211_p2 = scmp.lt.s32.totalorder %s205_s1, %s205_s1 }
   0xc   :  { %185 = vmatpush3.bf16.msra.mxu0 %v184_v10  ;;  %p212_p3 = por %p211_p2, %p210_p1 }
   0xd   :  { %186 = vmatprep.subr.bf16.mxu0 %v229_v3 }
   0xe   :  { %p213_p4 = pnand %p212_p3, %p206_p0 }
  0x10   :  { %188 = vmatpush3.bf16.msra.mxu0 %v187_v13 }
  0x11   :  { %189 = vmatprep.subr.bf16.mxu0 %v229_v3 }
  0x14   :  { %191 = vmatpush3.bf16.msra.mxu0 %v190_v16 }
  0x15   :  { %192 = vmatprep.subr.bf16.mxu0 %v229_v3 }
  0x18   :  { %194 = vmatpush3.bf16.msra.mxu0 %v193_v19 }
  0x19   :  { %195 = vmatprep.subr.bf16.mxu0 %v229_v3 }
  0x1c   :  { %197 = vmatpush3.bf16.msra.mxu0 %v196_v22 }
  0x1d   :  { %198 = vmatprep.subr.bf16.mxu0 %v229_v3 }
  0x20   :  { %200 = vmatpush3.bf16.msra.mxu0 %v199_v25 }
  0x23   :  { %175 = vmatmul.mubr.f32.vlgmr.msra.gmra.mrb[0].mxu0 %v15_v26 }
  0xf6   :  { %v105_v28 = vpop.f32.mrb[0].mxu0 }
  0xf7   :  { %v106_v29 = vadd.f32 %v124_v27, %v105_v28  ;;  %v176_v30 = vpop.f32.mrb[1].mxu0 }
  0xf9   :  { %109 = vst [vmem:[#allocation2] sm:$0xff] %v106_v29 }
  0xfa   :  { %216 = shalt.err (!%p213_p4)
}
  0xfb   :  { %s217_s24 = scalar_lea.hbm %s322_s3, 128 }
  0xfc   :  { %p218_p5 = scmp.ne.s32.totalorder %s322_s3, %s217_s24  ;;  %p221_p6 = scmp.lt.u32.totalorder %s217_s24, %s322_s3 }
  0xfe   :  { %p223_p7 = pnand %p221_p6, %p218_p5 }
 0x100   :  { %226 = shalt.err (!%p223_p7)
}
 0x101   :  { %119 = dma.vmem_to_hbm [thread:$0]  %s117_s22, 128, %s322_s3, [#allocation3]  }
 0x102   :  { %227 = dma.done.wait [#allocation3], 128  }
 0x103   :  { %228 = vsyncadd [#allocation3], 4294967168 }
 0x104   :  { %123 = vsyncpa [#allocation3], 1 }

</bundles_post_ra>
